<compile_context>
chip_gen: v7x
topology: tpu7x:2x2x1
jax: 0.10.0
libtpu: 0.0.40
codegen_flags: <defaults>
</compile_context>

<pallas_src>
import numpy as np

import jax
import jax.numpy as jnp
from jax.experimental import pallas as pl
from jax.experimental.pallas import tpu as pltpu


def mlp_kernel(x_ref, w1_ref, b1_ref, w2_ref, b2_ref, o_ref):
    """Per-tile body.

    x_ref : (Bt, C, TN) f32    w1_ref: (Hd, C) bf16   b1_ref: (Hd, 1) f32
    w2_ref: (C, Hd) bf16       b2_ref: (C, 1)  f32    o_ref : (Bt, C, TN)
    """
    w1 = w1_ref[...]
    w2 = w2_ref[...]
    b1 = b1_ref[...]
    b2 = b2_ref[...]
    # Small static unroll over the packed batch slab; each iteration is a pair of
    # lane-dense 2D MXU matmuls over a (C|Hd, TN) tile (TN is a 128-multiple).
    for b in range(x_ref.shape[0]):
        x_bf = x_ref[b].astype(jnp.bfloat16)          # bf16 MXU operand only
        h = jnp.dot(w1, x_bf, preferred_element_type=jnp.float32) + b1
        h = jnp.maximum(h, 0.0)                       # ReLU (f32 epilogue)
        # TODO(synk): Dropout(p=0.15) skipped (module forward in eval mode => identity).
        y = jnp.dot(w2, h.astype(jnp.bfloat16), preferred_element_type=jnp.float32) + b2
        # Residual: re-read x at the epilogue (short f32 live range, uses spare vld slots).
        o_ref[b] = (y + x_ref[b]).astype(o_ref.dtype)


def _vmem_capacity_bytes(default=64 * 1024 * 1024):
    """Per-generation VMEM capacity (v5e/v6e: 128 MiB, v7x: 64 MiB); conservative fallback."""
    try:
        info = pltpu.get_tpu_info()
        cap = getattr(info, "vmem_capacity_bytes", None)
        if cap:
            return int(cap)
    except Exception:
        pass
    return default


def _choose_tiles(B, C, Hd, N, in_bytes, out_bytes, vmem_budget,
                  target_block_bytes=4 << 20, max_batch_block=8):
    """Pick (Bt, tile_n): the biggest lane-dense block that fits the VMEM budget,
    targeting a few MiB streamed per grid step (the kernel is memory-bound)."""

    def fits(bt, tn):
        stream = 2 * bt * C * tn * (in_bytes + out_bytes)      # double-buffered x in / out
        interm = bt * (Hd + C) * tn * 6                        # h, y (f32) + bf16 copies
        wbytes = 2 * (2 * Hd * C * 2 + (Hd + C) * 4)           # resident weights + biases
        return stream + interm + wbytes + (2 << 20) <= vmem_budget

    # Candidate spatial tiles: 128-multiples dividing N, plus N itself (full extent).
    cands = sorted({t for t in range(128, N + 1, 128) if N % t == 0} | {N})
    tile_n = cands[0]
    for t in cands:
        if fits(1, t) and C * t * in_bytes <= target_block_bytes:
            tile_n = t

    bt = 1
    if tile_n == N:
        # Whole spatial extent fits in one tile -> pack batch per step too (small-N regime).
        for b in range(2, min(B, max_batch_block) + 1):
            if B % b == 0 and fits(b, tile_n) and b * C * tile_n * in_bytes <= target_block_bytes:
                bt = b
    return bt, tile_n


def mlp_forward(x_nchw, w1, b1, w2, b2, *, out_dtype=None, target_block_bytes=4 << 20):
    """x_nchw: (B, C, H, W).
    Weights in conv (out, in) matmul form: w1: (Hd, C), b1: (Hd,), w2: (C, Hd), b2: (C,).
    Set out_dtype=jnp.bfloat16 to halve store traffic when downstream tolerates bf16.
    """
    B, C, H, W = x_nchw.shape
    Hd = w1.shape[0]
    assert w1.shape == (Hd, C)
    assert w2.shape == (C, Hd), "residual add requires fc2 out_channels == input_dim"

    out_dtype = x_nchw.dtype if out_dtype is None else out_dtype
    N = H * W
    x3d = x_nchw.reshape(B, C, N)   # free view: channels on sublanes, pixels on lanes

    # Generation-aware VMEM budget; leave headroom for compiler-internal scratch.
    vmem_cap = _vmem_capacity_bytes()
    vmem_budget = int(0.70 * vmem_cap)

    in_bytes = int(np.dtype(x_nchw.dtype).itemsize)
    out_bytes = int(np.dtype(out_dtype).itemsize)
    bt, tile_n = _choose_tiles(B, C, Hd, N, in_bytes, out_bytes, vmem_budget,
                               target_block_bytes=target_block_bytes)
    assert N % tile_n == 0 and B % bt == 0
    # TODO(synk): no masking for ragged spatial sizes; H*W must be a 128-multiple or small
    # enough to use tile_n == N.

    # bf16 weights (MXU operands); biases stay f32 (epilogue precision).
    w1_bf = w1.astype(jnp.bfloat16)
    w2_bf = w2.astype(jnp.bfloat16)
    b1_c = b1.reshape(Hd, 1).astype(jnp.float32)
    b2_c = b2.reshape(C, 1).astype(jnp.float32)

    grid = (B // bt, N // tile_n)

    # Weights/biases have a constant index_map: single-buffer them once they are large
    # enough to matter (VMEM there trades directly against tile_n, esp. on v7x's 64 MiB).
    single_buf_w = (Hd * C * 2) >= (1 << 20)

    def const_spec(shape):
        idx = lambda i, j, _n=len(shape): (0,) * _n
        if single_buf_w:
            return pl.BlockSpec(shape, idx, pipeline_mode=pl.Buffered(1))
        return pl.BlockSpec(shape, idx)

    # Explicit VMEM limit: streamed buffers + resident weights + intermediates + margin.
    stream = 2 * bt * C * tile_n * (in_bytes + out_bytes)
    wbytes = (1 if single_buf_w else 2) * (2 * Hd * C * 2 + (Hd + C) * 4)
    interm = bt * (Hd + C) * tile_n * 6
    vmem_limit = int(min(max(stream + wbytes + interm + (4 << 20), 32 << 20), vmem_budget))

    # Advisory cost hint for XLA scheduling around the custom call.
    cost = pl.CostEstimate(
        flops=4 * B * N * C * Hd + 3 * B * N * C,
        transcendentals=0,
        bytes_accessed=B * C * N * (in_bytes + out_bytes) + 2 * Hd * C * 2 + (Hd + C) * 4,
    )

    # NOTE: if DMA is still exposed after enlarging tiles, sweep
    # pipeline_mode=pl.Buffered(3) on the x input spec below.
    out3d = pl.pallas_call(
        mlp_kernel,
        out_shape=jax.ShapeDtypeStruct((B, C, N), out_dtype),
        grid_spec=pltpu.PrefetchScalarGridSpec(
            num_scalar_prefetch=0,
            grid=grid,
            in_specs=[
                pl.BlockSpec((bt, C, tile_n), lambda i, j: (i, 0, j)),  # x slab (streamed)
                const_spec((Hd, C)),   # W1 (grid-resident)
                const_spec((Hd, 1)),   # b1
                const_spec((C, Hd)),   # W2 (grid-resident)
                const_spec((C, 1)),    # b2
            ],
            out_specs=pl.BlockSpec((bt, C, tile_n), lambda i, j: (i, 0, j)),
        ),
        compiler_params=pltpu.CompilerParams(
            dimension_semantics=("parallel", "parallel"),   # both grid axes independent
            vmem_limit_bytes=vmem_limit,
        ),
        cost_estimate=cost,
    )(x3d, w1_bf, b1_c, w2_bf, b2_c)

    return out3d.reshape(B, C, H, W)


def reference_forward_f32(x, w1, b1, w2, b2):
    """Plain-JAX f32 reference mirroring the PyTorch module (eval mode)."""
    B, C, H, W = x.shape
    x3 = x.reshape(B, C, H * W)
    h = jnp.maximum(jnp.einsum("oc,bcn->bon", w1, x3) + b1.reshape(1, -1, 1), 0.0)
    y = jnp.einsum("oh,bhn->bon", w2, h) + b2.reshape(1, -1, 1) + x3
    return y.reshape(B, C, H, W)


def reference_forward_bf16(x, w1, b1, w2, b2):
    """Reference that emulates the kernel's bf16 matmul operands (f32 accumulate/epilogue)."""
    B, C, H, W = x.shape
    x3 = x.reshape(B, C, H * W)
    xb = x3.astype(jnp.bfloat16)
    h = jnp.einsum("oc,bcn->bon", w1.astype(jnp.bfloat16), xb,
                   preferred_element_type=jnp.float32) + b1.reshape(1, -1, 1)
    h = jnp.maximum(h, 0.0)
    y = jnp.einsum("oh,bhn->bon", w2.astype(jnp.bfloat16), h.astype(jnp.bfloat16),
                   preferred_element_type=jnp.float32) + b2.reshape(1, -1, 1) + x3
    return y.reshape(B, C, H, W)


if __name__ == "__main__":
    # Residual `hidden + input_data` implies input_dim == hidden_dim.
    B, C, H, W = 2, 32, 16, 16
    hidden_dim = C

    key = jax.random.PRNGKey(0)
    kx, k1, k2, k3, k4 = jax.random.split(key, 5)

    x = jax.random.normal(kx, (B, C, H, W), dtype=jnp.float32)

    # Conv2d(k=1) weight (out, in, 1, 1) -> matmul form (out, in); PyTorch-style uniform init.
    bound1 = 1.0 / jnp.sqrt(jnp.float32(C))
    w1 = jax.random.uniform(k1, (hidden_dim, C), jnp.float32, -bound1, bound1)
    b1 = jax.random.uniform(k2, (hidden_dim,), jnp.float32, -bound1, bound1)
    bound2 = 1.0 / jnp.sqrt(jnp.float32(hidden_dim))
    w2 = jax.random.uniform(k3, (C, hidden_dim), jnp.float32, -bound2, bound2)
    b2 = jax.random.uniform(k4, (C,), jnp.float32, -bound2, bound2)

    out = jax.block_until_ready(mlp_forward(x, w1, b1, w2, b2))
    ref32 = jax.block_until_ready(reference_forward_f32(x, w1, b1, w2, b2))
    refbf = jax.block_until_ready(reference_forward_bf16(x, w1, b1, w2, b2))

    assert out.shape == x.shape and out.dtype == x.dtype
    # Tight check vs a reference using the same bf16 matmul operands.
    assert jnp.allclose(out, refbf, atol=2e-3, rtol=2e-3), "mismatch vs bf16-matched reference"
    # Looser check vs the exact f32 module semantics (bf16 MXU operands introduce ~1e-2 error).
    assert jnp.allclose(out, ref32, atol=5e-2, rtol=5e-2), "mismatch vs f32 reference"
    print("KERNEL_OK")
</pallas_src>

<mosaic_0001>
module attributes {stable_mosaic.version = 11 : i64} {
  func.func @mlp_kernel(%arg0: i32, %arg1: i32, %arg2: memref<2x32x256xf32, #tpu.memory_space<vmem>>, %arg3: memref<32x32xbf16, #tpu.memory_space<vmem>>, %arg4: memref<32x1xf32, #tpu.memory_space<vmem>>, %arg5: memref<32x32xbf16, #tpu.memory_space<vmem>>, %arg6: memref<32x1xf32, #tpu.memory_space<vmem>>, %arg7: memref<2x32x256xf32, #tpu.memory_space<vmem>>) attributes {dimension_semantics = [#tpu.dimension_semantics<parallel>, #tpu.dimension_semantics<parallel>], iteration_bounds = array<i64: 1, 1>, scalar_prefetch = 0 : i64, scratch_operands = 0 : i64, tpu.core_type = #tpu.core_type<tc>, window_params = [{transform_indices = @transform_0, window_bounds = array<i64: 2, 32, 256>}, {pipeline_mode = #tpu.pipeline_mode<synchronous>, transform_indices = @transform_1, window_bounds = array<i64: 32, 32>}, {pipeline_mode = #tpu.pipeline_mode<synchronous>, transform_indices = @transform_2, window_bounds = array<i64: 32, 1>}, {pipeline_mode = #tpu.pipeline_mode<synchronous>, transform_indices = @transform_3, window_bounds = array<i64: 32, 32>}, {pipeline_mode = #tpu.pipeline_mode<synchronous>, transform_indices = @transform_4, window_bounds = array<i64: 32, 1>}, {transform_indices = @transform_5, window_bounds = array<i64: 2, 32, 256>}]} {
    %c0 = arith.constant 0 : index
    %c0_0 = arith.constant 0 : index
    %0 = vector.load %arg3[%c0, %c0_0] : memref<32x32xbf16, #tpu.memory_space<vmem>>, vector<32x32xbf16>
    %c0_1 = arith.constant 0 : index
    %c0_2 = arith.constant 0 : index
    %1 = vector.load %arg5[%c0_1, %c0_2] : memref<32x32xbf16, #tpu.memory_space<vmem>>, vector<32x32xbf16>
    %c0_3 = arith.constant 0 : index
    %c0_4 = arith.constant 0 : index
    %2 = vector.load %arg4[%c0_3, %c0_4] : memref<32x1xf32, #tpu.memory_space<vmem>>, vector<32x1xf32>
    %c0_5 = arith.constant 0 : index
    %c0_6 = arith.constant 0 : index
    %3 = vector.load %arg6[%c0_5, %c0_6] : memref<32x1xf32, #tpu.memory_space<vmem>>, vector<32x1xf32>
    %c0_7 = arith.constant 0 : index
    %c0_8 = arith.constant 0 : index
    %c0_9 = arith.constant 0 : index
    %4 = vector.load %arg2[%c0_7, %c0_8, %c0_9] : memref<2x32x256xf32, #tpu.memory_space<vmem>>, vector<1x32x256xf32>
    %5 = vector.shape_cast %4 : vector<1x32x256xf32> to vector<32x256xf32>
    %6 = arith.truncf %5 : vector<32x256xf32> to vector<32x256xbf16>
    %cst = arith.constant dense<0.000000e+00> : vector<32x256xf32>
    %7 = tpu.matmul %0, %6, %cst {dimension_numbers = #tpu.dot_dimension_numbers<[1], [0], [0], [1], [0, 0, 1, 1], [], []>} : vector<32x32xbf16>, vector<32x256xbf16>, vector<32x256xf32> -> vector<32x256xf32>
    %8 = vector.broadcast %2 : vector<32x1xf32> to vector<32x256xf32>
    %9 = arith.addf %7, %8 : vector<32x256xf32>
    %cst_10 = arith.constant 0.000000e+00 : f32
    %10 = vector.broadcast %cst_10 : f32 to vector<32x256xf32>
    %11 = arith.maximumf %9, %10 : vector<32x256xf32>
    %12 = arith.truncf %11 : vector<32x256xf32> to vector<32x256xbf16>
    %cst_11 = arith.constant dense<0.000000e+00> : vector<32x256xf32>
    %13 = tpu.matmul %1, %12, %cst_11 {dimension_numbers = #tpu.dot_dimension_numbers<[1], [0], [0], [1], [0, 0, 1, 1], [], []>} : vector<32x32xbf16>, vector<32x256xbf16>, vector<32x256xf32> -> vector<32x256xf32>
    %14 = vector.broadcast %3 : vector<32x1xf32> to vector<32x256xf32>
    %15 = arith.addf %13, %14 : vector<32x256xf32>
    %c0_12 = arith.constant 0 : index
    %c0_13 = arith.constant 0 : index
    %c0_14 = arith.constant 0 : index
    %16 = vector.load %arg2[%c0_12, %c0_13, %c0_14] : memref<2x32x256xf32, #tpu.memory_space<vmem>>, vector<1x32x256xf32>
    %17 = vector.shape_cast %16 : vector<1x32x256xf32> to vector<32x256xf32>
    %18 = arith.addf %15, %17 : vector<32x256xf32>
    %c0_15 = arith.constant 0 : index
    %c0_16 = arith.constant 0 : index
    %c0_17 = arith.constant 0 : index
    %19 = vector.load %arg7[%c0_15, %c0_16, %c0_17] : memref<2x32x256xf32, #tpu.memory_space<vmem>>, vector<1x32x256xf32>
    %20 = vector.shape_cast %19 : vector<1x32x256xf32> to vector<32x256xf32>
    %21 = vector.shape_cast %18 : vector<32x256xf32> to vector<1x32x256xf32>
    tpu.vector_store %arg7[%c0_15, %c0_16, %c0_17], %21 {strides = array<i32>} : memref<2x32x256xf32, #tpu.memory_space<vmem>>, vector<1x32x256xf32>,
    %c1 = arith.constant 1 : index
    %c0_18 = arith.constant 0 : index
    %c0_19 = arith.constant 0 : index
    %22 = vector.load %arg2[%c1, %c0_18, %c0_19] : memref<2x32x256xf32, #tpu.memory_space<vmem>>, vector<1x32x256xf32>
    %23 = vector.shape_cast %22 : vector<1x32x256xf32> to vector<32x256xf32>
    %24 = arith.truncf %23 : vector<32x256xf32> to vector<32x256xbf16>
    %cst_20 = arith.constant dense<0.000000e+00> : vector<32x256xf32>
    %25 = tpu.matmul %0, %24, %cst_20 {dimension_numbers = #tpu.dot_dimension_numbers<[1], [0], [0], [1], [0, 0, 1, 1], [], []>} : vector<32x32xbf16>, vector<32x256xbf16>, vector<32x256xf32> -> vector<32x256xf32>
    %26 = vector.broadcast %2 : vector<32x1xf32> to vector<32x256xf32>
    %27 = arith.addf %25, %26 : vector<32x256xf32>
    %cst_21 = arith.constant 0.000000e+00 : f32
    %28 = vector.broadcast %cst_21 : f32 to vector<32x256xf32>
    %29 = arith.maximumf %27, %28 : vector<32x256xf32>
    %30 = arith.truncf %29 : vector<32x256xf32> to vector<32x256xbf16>
    %cst_22 = arith.constant dense<0.000000e+00> : vector<32x256xf32>
    %31 = tpu.matmul %1, %30, %cst_22 {dimension_numbers = #tpu.dot_dimension_numbers<[1], [0], [0], [1], [0, 0, 1, 1], [], []>} : vector<32x32xbf16>, vector<32x256xbf16>, vector<32x256xf32> -> vector<32x256xf32>
    %32 = vector.broadcast %3 : vector<32x1xf32> to vector<32x256xf32>
    %33 = arith.addf %31, %32 : vector<32x256xf32>
    %c1_23 = arith.constant 1 : index
    %c0_24 = arith.constant 0 : index
    %c0_25 = arith.constant 0 : index
    %34 = vector.load %arg2[%c1_23, %c0_24, %c0_25] : memref<2x32x256xf32, #tpu.memory_space<vmem>>, vector<1x32x256xf32>
    %35 = vector.shape_cast %34 : vector<1x32x256xf32> to vector<32x256xf32>
    %36 = arith.addf %33, %35 : vector<32x256xf32>
    %c1_26 = arith.constant 1 : index
    %c0_27 = arith.constant 0 : index
    %c0_28 = arith.constant 0 : index
    %37 = vector.load %arg7[%c1_26, %c0_27, %c0_28] : memref<2x32x256xf32, #tpu.memory_space<vmem>>, vector<1x32x256xf32>
    %38 = vector.shape_cast %37 : vector<1x32x256xf32> to vector<32x256xf32>
    %39 = vector.shape_cast %36 : vector<32x256xf32> to vector<1x32x256xf32>
    tpu.vector_store %arg7[%c1_26, %c0_27, %c0_28], %39 {strides = array<i32>} : memref<2x32x256xf32, #tpu.memory_space<vmem>>, vector<1x32x256xf32>,
    return
  }
  func.func @transform_0(%arg0: i32, %arg1: i32) -> (i32, i32, i32) {
    %c0_i32 = arith.constant 0 : i32
    %c0_i32_0 = arith.constant 0 : i32
    return %arg0, %c0_i32, %arg1 : i32, i32, i32
  }
  func.func @transform_1(%arg0: i32, %arg1: i32) -> (i32, i32) {
    %c0_i32 = arith.constant 0 : i32
    %c0_i32_0 = arith.constant 0 : i32
    %c0_i32_1 = arith.constant 0 : i32
    return %c0_i32, %c0_i32_0 : i32, i32
  }
  func.func @transform_2(%arg0: i32, %arg1: i32) -> (i32, i32) {
    %c0_i32 = arith.constant 0 : i32
    %c0_i32_0 = arith.constant 0 : i32
    %c0_i32_1 = arith.constant 0 : i32
    return %c0_i32, %c0_i32_0 : i32, i32
  }
  func.func @transform_3(%arg0: i32, %arg1: i32) -> (i32, i32) {
    %c0_i32 = arith.constant 0 : i32
    %c0_i32_0 = arith.constant 0 : i32
    %c0_i32_1 = arith.constant 0 : i32
    return %c0_i32, %c0_i32_0 : i32, i32
  }
  func.func @transform_4(%arg0: i32, %arg1: i32) -> (i32, i32) {
    %c0_i32 = arith.constant 0 : i32
    %c0_i32_0 = arith.constant 0 : i32
    %c0_i32_1 = arith.constant 0 : i32
    return %c0_i32, %c0_i32_0 : i32, i32
  }
  func.func @transform_5(%arg0: i32, %arg1: i32) -> (i32, i32, i32) {
    %c0_i32 = arith.constant 0 : i32
    %c0_i32_0 = arith.constant 0 : i32
    return %arg0, %c0_i32, %arg1 : i32, i32, i32
  }
}

</mosaic_0001>

<bundles_post_ra>
// kernel: tpu_custom_call.1
= control target key start
LH: loop header
LB: loop body
LE: loop exit
PB: predicated region body
PF: predicated region fallthrough
CT: control target
= control target key end

     0   :  { %10 = vsyncpa [#allocation3], 0  ;;  %s690_s0 = inlined_call_operand.hbm [shape: f32[2,32,256], index: 0, kind: input, shape index: {}]   ;;  %s691_s1 = inlined_call_operand.vmem [shape: bf16[32,32], index: 1, kind: input, shape index: {}]   ;;  %s692_s2 = inlined_call_operand.vmem [shape: f32[32,1], index: 2, kind: input, shape index: {}]   ;;  %s693_s3 = inlined_call_operand.vmem [shape: bf16[32,32], index: 3, kind: input, shape index: {}]   ;;  %s694_s4 = inlined_call_operand.vmem [shape: f32[32,1], index: 4, kind: input, shape index: {}]   ;;  %s695_s5 = inlined_call_operand.hbm [shape: f32[2,32,256], index: 5, kind: output, shape index: {}]  }
   0x1   :  { %11 = vsyncpa [#allocation4], 0  ;;  %s507_s18 = smov [#allocation2]   ;;  %s459_s22 = scalar_lea.hbm %s690_s0, 2048 }
   0x2   :  { %s17_s19 = sshll.u32 %s507_s18, 4  ;;  %p460_p0 = scmp.ne.s32.totalorder %s690_s0, %s459_s22  ;;  %s18_s19 = int_to_ptr.vmem [resolvable:$true] %s17_s19 }
   0x3   :  { %p463_p1 = scmp.lt.u32.totalorder %s459_s22, %s690_s0 }
   0x5   :  { %p465_p2 = pnand %p463_p1, %p460_p0 }
   0x7   :  { %468 = shalt.err (!%p465_p2)
}
   0x8   :  { %s469_s27 = scalar_lea.vmem %s18_s19, 2048  ;;  %p474_p4 = scmp.lt.s32.totalorder %s18_s19, %s18_s19 }
   0x9   :  { %p470_p3 = scmp.ne.s32.totalorder %s18_s19, %s469_s27  ;;  %p475_p5 = scmp.lt.s32.totalorder %s469_s27, %s469_s27 }
   0xb   :  { %p476_p6 = por %p475_p5, %p474_p4 }
   0xd   :  { %p477_p7 = pnand %p476_p6, %p470_p3 }
   0xf   :  { %480 = shalt.err (!%p477_p7)
}
  0x10   :  { %s508_s28 = smov 256   ;;  %s509_s29 = smov 16  }
  0x11   :  { %23 = dma.hbm_to_vmem [thread:$0]  %s690_s0, 2048, %s18_s19, [#allocation3], %s508_s28, %s508_s28, %s509_s29  }
  0x12   :  { %503 = dma.done.wait [#allocation3], 2048  }
  0x13   :  { %504 = vsyncadd [#allocation3], 4294965248  ;;  %v510_v0 = vmov 0   ;;  %v561_v1 = vld [vmem:[#allocation2 + $0x8] sm:$0xff]  ;;  %v563_v2 = vld [vmem:[#allocation2 + $0x18] sm:$0xff]  ;;  %vm94_vm0 = vcmask 261120  }
  0x14   :  { %133 = vmatprep.mubr.bf16.mxu0 %v510_v0  ;;  %453 = vset.pattern.permute.xlu0 %v510_v0  ;;  %v565_v3 = vld [vmem:[#allocation2] sm:$0xff]  ;;  %v61_v4 = vpack.c.bf16 %v563_v2, %v561_v1  ;;  %v569_v5 = vld [vmem:[#allocation2 + $0x10] sm:$0xff]  ;;  %v571_v6 = vld [vmem:[#allocation2 + $0x28] sm:$0xff] }
  0x15   :  { %454 = vset.pattern.permute.xlu1 %v510_v0  ;;  %234 = vmatprep.mubr.bf16.mxu1 %v510_v0  ;;  %v573_v7 = vld [vmem:[#allocation2 + $0x38] sm:$0xff]  ;;  %v60_v8 = vpack.c.bf16 %v569_v5, %v565_v3  ;;  %v579_v10 = vld [vmem:[#allocation2 + $0x20] sm:$0xff]  ;;  %v581_v11 = vld [vmem:[#allocation2 + $0x30] sm:$0xff] }
  0x16   :  { %v63_v9 = vpack.c.bf16 %v573_v7, %v571_v6  ;;  %101 = vmatprep.subr.bf16.mxu0 %v61_v4  ;;  %v583_v12 = vld [vmem:[#allocation2 + $0x48] sm:$0xff]  ;;  %v62_v13 = vpack.c.bf16 %v581_v11, %v579_v10  ;;  %v587_v14 = vld [vmem:[#allocation2 + $0x58] sm:$0xff]  ;;  %v589_v15 = vld [vmem:[#allocation2 + $0x40] sm:$0xff] }
  0x17   :  { %102 = vmatpush1.bf16.msra.mxu0 %v60_v8  ;;  %v281_v16 = vpack.c.bf16 %v587_v14, %v583_v12  ;;  %v593_v17 = vld [vmem:[#allocation2 + $0x50] sm:$0xff]  ;;  %v595_v18 = vld [vmem:[#allocation2 + $0x68] sm:$0xff]  ;;  %v597_v19 = vld [vmem:[#allocation2 + $0x78] sm:$0xff] }
  0x18   :  { %103 = vmatprep.subr.bf16.mxu0 %v63_v9  ;;  %v455_v20 = vld [vmem:[%s691_s1] sm:$0xff]   ;;  %v46_v22 = vld [vmem:[%s692_s2 + $0x10] sm:$0xff]  ;;  %v280_v23 = vpack.c.bf16 %v593_v17, %v589_v15  ;;  %v283_v24 = vpack.c.bf16 %v597_v19, %v595_v18  ;;  %v45_v27 = vld [vmem:[%s692_s2 + $0x8] sm:$0xff] }
  0x19   :  { %v44_v21 = vld [vmem:[%s692_s2] sm:$0xff]  ;;  %v614_v26 = vld [vmem:[#allocation2 + $0x70] sm:$0xff]  ;;  %76 = vperm.xlu1 %454, %v46_v22   ;;  %v47_v28 = vld [vmem:[%s692_s2 + $0x18] sm:$0xff] }
  0x1a   :  { %66 = vperm.xlu0 %453, %v44_v21   ;;  %v612_v25 = vld [vmem:[#allocation2 + $0x60] sm:$0xff]  ;;  %v456_v31 = vld [vmem:[%s691_s1 + $0x8] sm:$0xff]   ;;  %v50_v33 = vld [vmem:[%s694_s4 + $0x10] sm:$0xff] }
  0x1b   :  { %104 = vmatpush1.bf16.msra.mxu0 %v62_v13  ;;  %v282_v29 = vpack.c.bf16 %v614_v26, %v612_v25  ;;  %v48_v30 = vld [vmem:[%s694_s4] sm:$0xff]  ;;  %v49_v32 = vld [vmem:[%s694_s4 + $0x8] sm:$0xff]  ;;  %v51_v34 = vld [vmem:[%s694_s4 + $0x18] sm:$0xff] }
  0x1c   :  { %284 = vmatprep.subr.bf16.mxu0 %v281_v16 }
  0x1d   :  { %81 = vperm.xlu1 %454, %v47_v28  }
  0x1e   :  { %438 = vmatmul.mubr.msk.bf16.vlgmr.msra.gmra.mrb[0].mxu0 %vm94_vm0, %v455_v20  ;;  %71 = vperm.xlu0 %453, %v45_v27  }
  0x1f   :  { %285 = vmatpush1.bf16.msra.mxu0 %v280_v23  ;;  %143 = vmatprep.mubr.bf16.mxu0 %v510_v0  ;;  %v457_v23 = vld [vmem:[%s693_s3] sm:$0xff]  }
  0x20   :  { %286 = vmatprep.subr.bf16.mxu0 %v283_v24 }
  0x21   :  { %173 = vperm.xlu1 %454, %v49_v32  }
  0x22   :  { %168 = vperm.xlu0 %453, %v48_v30  }
  0x23   :  { %287 = vmatpush1.bf16.msra.mxu0 %v282_v29 }
  0x25   :  { %183 = vperm.xlu1 %454, %v51_v34  }
  0x26   :  { %439 = vmatmul.mubr.msk.bf16.gmra.mrb[4].mxu0 %vm94_vm0, %v456_v31  ;;  %178 = vperm.xlu0 %453, %v50_v33  }
  0x27   :  { %316 = vmatprep.mubr.bf16.mxu0 %v510_v0 }
  0x2e   :  { %444 = vmatmul.mubr.msk.bf16.vlgmr.msra.gmra.mrb[8].mxu0 %vm94_vm0, %v455_v20 }
  0x2f   :  { %326 = vmatprep.mubr.bf16.mxu0 %v510_v0 }
  0x36   :  { %445 = vmatmul.mubr.msk.bf16.gmra.mrb[12].mxu0 %vm94_vm0, %v456_v31 }
  0x98   :  { %v77_v44 = vpop.permute.xlu1 %76 }
  0x99   :  { %v67_v35 = vpop.permute.xlu0 %66 }
  0x9c   :  { %v82_v55 = vpop.permute.xlu1 %81 }
  0x9d   :  { %v72_v39 = vpop.permute.xlu0 %71 }
  0xf1   :  { %v135_v36 = vpop.f32.mrb[0].mxu0 }
  0xf2   :  { %v136_v37 = vadd.f32 %v135_v36, %v67_v35  ;;  %v137_v38 = vpop.f32.mrb[1].mxu0 }
  0xf3   :  { %v138_v40 = vadd.f32 %v137_v38, %v67_v35  ;;  %v139_v41 = vpop.f32.mrb[2].mxu0 }
  0xf4   :  { %v140_v42 = vadd.f32 %v139_v41, %v72_v39  ;;  %v141_v43 = vpop.f32.mrb[3].mxu0  ;;  %v154_v46 = vmax.f32 %v136_v37, 0.0 }
  0xf5   :  { %v142_v45 = vadd.f32 %v141_v43, %v72_v39  ;;  %v155_v48 = vmax.f32 %v138_v40, 0.0 }
  0xf6   :  { %v156_v47 = vmax.f32 %v140_v42, 0.0 }
  0xf7   :  { %v157_v49 = vmax.f32 %v142_v45, 0.0 }
  0xf8   :  { %v162_v50 = vpack.c.bf16 %v156_v47, %v154_v46 }
  0xf9   :  { %v145_v51 = vpop.f32.mrb[4].mxu0  ;;  %v163_v52 = vpack.c.bf16 %v157_v49, %v155_v48 }
  0xfa   :  { %v146_v53 = vadd.f32 %v145_v51, %v77_v44  ;;  %v147_v54 = vpop.f32.mrb[5].mxu0 }
  0xfb   :  { %v148_v56 = vadd.f32 %v147_v54, %v77_v44  ;;  %v149_v57 = vpop.f32.mrb[6].mxu0  ;;  %202 = vmatprep.subr.bf16.mxu1 %v163_v52  ;;  %v174_v54 = vpop.permute.xlu1 %173 }
  0xfc   :  { %v150_v58 = vadd.f32 %v149_v57, %v82_v55  ;;  %v151_v59 = vpop.f32.mrb[7].mxu0  ;;  %203 = vmatpush1.bf16.msra.mxu1 %v162_v50  ;;  %v158_v61 = vmax.f32 %v146_v53, 0.0  ;;  %v169_v50 = vpop.permute.xlu0 %168 }
  0xfd   :  { %v152_v60 = vadd.f32 %v151_v59, %v82_v55  ;;  %v159_v63 = vmax.f32 %v148_v56, 0.0 }
  0xfe   :  { %v160_v62 = vmax.f32 %v150_v58, 0.0 }
  0xff   :  { %v161_v4 = vmax.f32 %v152_v60, 0.0 }
 0x100   :  { %v164_v8 = vpack.c.bf16 %v160_v62, %v158_v61 }
 0x101   :  { %v165_v9 = vpack.c.bf16 %v161_v4, %v159_v63  ;;  %v318_v13 = vpop.f32.mrb[8].mxu0  ;;  %v179_v63 = vpop.permute.xlu0 %178 }
 0x102   :  { %v319_v16 = vadd.f32 %v318_v13, %v67_v35  ;;  %v320_v20 = vpop.f32.mrb[9].mxu0  ;;  %v184_v13 = vpop.permute.xlu1 %183 }
 0x103   :  { %v321_v21 = vadd.f32 %v320_v20, %v67_v35  ;;  %204 = vmatprep.subr.bf16.mxu1 %v165_v9  ;;  %v322_v22 = vpop.f32.mrb[10].mxu0 }
 0x104   :  { %v323_v24 = vadd.f32 %v322_v22, %v72_v39  ;;  %205 = vmatpush1.bf16.msra.mxu1 %v164_v8  ;;  %v324_v27 = vpop.f32.mrb[11].mxu0  ;;  %v337_v29 = vmax.f32 %v319_v16, 0.0 }
 0x105   :  { %v325_v28 = vadd.f32 %v324_v27, %v72_v39  ;;  %v338_v31 = vmax.f32 %v321_v21, 0.0  ;;  %v458_v39 = vld [vmem:[%s693_s3 + $0x8] sm:$0xff]   ;;  %s511_s3 = smov [#allocation5]  }
 0x106   :  { %v339_v30 = vmax.f32 %v323_v24, 0.0  ;;  %s424_s27 = sshll.u32 %s511_s3, 4  ;;  %s425_s27 = int_to_ptr.vmem [resolvable:$true] %s424_s27 }
 0x107   :  { %v340_v32 = vmax.f32 %v325_v28, 0.0  ;;  %442 = vmatmul.mubr.msk.bf16.vlgmr.msra.gmra.mrb[0].mxu1 %vm94_vm0, %v457_v23  ;;  %s481_s30 = scalar_lea.vmem %s425_s27, 2048  ;;  %p486_p9 = scmp.lt.s32.totalorder %s425_s27, %s425_s27 }
 0x108   :  { %v345_v33 = vpack.c.bf16 %v339_v30, %v337_v29  ;;  %244 = vmatprep.mubr.bf16.mxu1 %v510_v0  ;;  %p482_p8 = scmp.ne.s32.totalorder %s425_s27, %s481_s30  ;;  %p487_p10 = scmp.lt.s32.totalorder %s481_s30, %s481_s30 }
 0x109   :  { %v346_v34 = vpack.c.bf16 %v340_v32, %v338_v31  ;;  %v328_v35 = vpop.f32.mrb[12].mxu0 }
 0x10a   :  { %v329_v36 = vadd.f32 %v328_v35, %v77_v44  ;;  %v330_v37 = vpop.f32.mrb[13].mxu0  ;;  %p488_p11 = por %p487_p10, %p486_p9 }
 0x10b   :  { %v331_v38 = vadd.f32 %v330_v37, %v77_v44  ;;  %v332_v40 = vpop.f32.mrb[14].mxu0  ;;  %349 = vmatprep.subr.bf16.mxu1 %v346_v34 }
 0x10c   :  { %v333_v41 = vadd.f32 %v332_v40, %v82_v55  ;;  %v334_v42 = vpop.f32.mrb[15].mxu0  ;;  %350 = vmatpush1.bf16.msra.mxu1 %v345_v33  ;;  %v341_v45 = vmax.f32 %v329_v36, 0.0  ;;  %p489_p12 = pnand %p488_p11, %p482_p8 }
 0x10d   :  { %v335_v43 = vadd.f32 %v334_v42, %v82_v55  ;;  %v342_v47 = vmax.f32 %v331_v38, 0.0 }
 0x10e   :  { %v343_v46 = vmax.f32 %v333_v41, 0.0 }
 0x10f   :  { %v344_v48 = vmax.f32 %v335_v43, 0.0  ;;  %443 = vmatmul.mubr.msk.bf16.gmra.mrb[4].mxu1 %vm94_vm0, %v458_v39 }
 0x110   :  { %v347_v49 = vpack.c.bf16 %v343_v46, %v341_v45  ;;  %381 = vmatprep.mubr.bf16.mxu1 %v510_v0 }
 0x111   :  { %v348_v44 = vpack.c.bf16 %v344_v48, %v342_v47 }
 0x113   :  { %351 = vmatprep.subr.bf16.mxu1 %v348_v44 }
 0x114   :  { %352 = vmatpush1.bf16.msra.mxu1 %v347_v49 }
 0x117   :  { %446 = vmatmul.mubr.msk.bf16.vlgmr.msra.gmra.mrb[8].mxu1 %vm94_vm0, %v457_v23 }
 0x118   :  { %391 = vmatprep.mubr.bf16.mxu1 %v510_v0 }
 0x11f   :  { %447 = vmatmul.mubr.msk.bf16.gmra.mrb[12].mxu1 %vm94_vm0, %v458_v39 }
 0x1da   :  { %v236_v51 = vpop.f32.mrb[0].mxu1 }
 0x1db   :  { %v237_v52 = vadd.f32 %v236_v51, %v169_v50  ;;  %v238_v53 = vpop.f32.mrb[1].mxu1 }
 0x1dc   :  { %v239_v55 = vadd.f32 %v238_v53, %v169_v50  ;;  %v240_v56 = vpop.f32.mrb[2].mxu1 }
 0x1dd   :  { %v255_v57 = vadd.f32 %v237_v52, %v565_v3  ;;  %v241_v58 = vadd.f32 %v240_v56, %v174_v54  ;;  %v242_v59 = vpop.f32.mrb[3].mxu1 }
 0x1de   :  { %v256_v60 = vadd.f32 %v239_v55, %v561_v1  ;;  %v243_v61 = vadd.f32 %v242_v59, %v174_v54 }
 0x1df   :  { %263 = vst [vmem:[#allocation5] sm:$0xff] %v255_v57  ;;  %v257_v62 = vadd.f32 %v241_v58, %v569_v5 }
 0x1e0   :  { %264 = vst [vmem:[#allocation5 + $0x8] sm:$0xff] %v256_v60  ;;  %v258_v0 = vadd.f32 %v243_v61, %v563_v2 }
 0x1e1   :  { %265 = vst [vmem:[#allocation5 + $0x10] sm:$0xff] %v257_v62 }
 0x1e2   :  { %266 = vst [vmem:[#allocation5 + $0x18] sm:$0xff] %v258_v0  ;;  %v246_v4 = vpop.f32.mrb[4].mxu1 }
 0x1e3   :  { %v247_v8 = vadd.f32 %v246_v4, %v179_v63  ;;  %v248_v9 = vpop.f32.mrb[5].mxu1 }
 0x1e4   :  { %v249_v16 = vadd.f32 %v248_v9, %v179_v63  ;;  %v250_v3 = vpop.f32.mrb[6].mxu1 }
 0x1e5   :  { %v259_v20 = vadd.f32 %v247_v8, %v579_v10  ;;  %v251_v21 = vadd.f32 %v250_v3, %v184_v13  ;;  %v252_v1 = vpop.f32.mrb[7].mxu1 }
 0x1e6   :  { %v260_v22 = vadd.f32 %v249_v16, %v571_v6  ;;  %v253_v23 = vadd.f32 %v252_v1, %v184_v13 }
 0x1e7   :  { %267 = vst [vmem:[#allocation5 + $0x20] sm:$0xff] %v259_v20  ;;  %v261_v5 = vadd.f32 %v251_v21, %v581_v11 }
 0x1e8   :  { %268 = vst [vmem:[#allocation5 + $0x28] sm:$0xff] %v260_v22  ;;  %v262_v2 = vadd.f32 %v253_v23, %v573_v7 }
 0x1e9   :  { %269 = vst [vmem:[#allocation5 + $0x30] sm:$0xff] %v261_v5 }
 0x1ea   :  { %270 = vst [vmem:[#allocation5 + $0x38] sm:$0xff] %v262_v2  ;;  %v383_v24 = vpop.f32.mrb[8].mxu1 }
 0x1eb   :  { %v384_v27 = vadd.f32 %v383_v24, %v169_v50  ;;  %v385_v28 = vpop.f32.mrb[9].mxu1 }
 0x1ec   :  { %v386_v29 = vadd.f32 %v385_v28, %v169_v50  ;;  %v387_v30 = vpop.f32.mrb[10].mxu1 }
 0x1ed   :  { %v402_v10 = vadd.f32 %v384_v27, %v589_v15  ;;  %v388_v31 = vadd.f32 %v387_v30, %v174_v54  ;;  %v389_v32 = vpop.f32.mrb[11].mxu1 }
 0x1ee   :  { %v403_v6 = vadd.f32 %v386_v29, %v583_v12  ;;  %v390_v33 = vadd.f32 %v389_v32, %v174_v54 }
 0x1ef   :  { %411 = vst [vmem:[#allocation5 + $0x40] sm:$0xff] %v402_v10  ;;  %v404_v11 = vadd.f32 %v388_v31, %v593_v17 }
 0x1f0   :  { %412 = vst [vmem:[#allocation5 + $0x48] sm:$0xff] %v403_v6  ;;  %v405_v7 = vadd.f32 %v390_v33, %v587_v14 }
 0x1f1   :  { %413 = vst [vmem:[#allocation5 + $0x50] sm:$0xff] %v404_v11 }
 0x1f2   :  { %414 = vst [vmem:[#allocation5 + $0x58] sm:$0xff] %v405_v7  ;;  %v393_v34 = vpop.f32.mrb[12].mxu1 }
 0x1f3   :  { %v394_v35 = vadd.f32 %v393_v34, %v179_v63  ;;  %v395_v36 = vpop.f32.mrb[13].mxu1 }
 0x1f4   :  { %v396_v37 = vadd.f32 %v395_v36, %v179_v63  ;;  %v397_v38 = vpop.f32.mrb[14].mxu1 }
 0x1f5   :  { %v406_v15 = vadd.f32 %v394_v35, %v612_v25  ;;  %v398_v40 = vadd.f32 %v397_v38, %v184_v13  ;;  %v399_v39 = vpop.f32.mrb[15].mxu1 }
 0x1f6   :  { %v407_v12 = vadd.f32 %v396_v37, %v595_v18  ;;  %v400_v41 = vadd.f32 %v399_v39, %v184_v13 }
 0x1f7   :  { %415 = vst [vmem:[#allocation5 + $0x60] sm:$0xff] %v406_v15  ;;  %v408_v17 = vadd.f32 %v398_v40, %v614_v26 }
 0x1f8   :  { %416 = vst [vmem:[#allocation5 + $0x68] sm:$0xff] %v407_v12  ;;  %v409_v14 = vadd.f32 %v400_v41, %v597_v19 }
 0x1f9   :  { %417 = vst [vmem:[#allocation5 + $0x70] sm:$0xff] %v408_v17 }
 0x1fa   :  { %418 = vst [vmem:[#allocation5 + $0x78] sm:$0xff] %v409_v14 }
 0x1fb   :  { %492 = shalt.err (!%p489_p12)
}
 0x1fc   :  { %s493_s7 = scalar_lea.hbm %s695_s5, 2048 }
 0x1fd   :  { %p494_p13 = scmp.ne.s32.totalorder %s695_s5, %s493_s7  ;;  %p497_p0 = scmp.lt.u32.totalorder %s493_s7, %s695_s5 }
 0x1ff   :  { %p499_p1 = pnand %p497_p0, %p494_p13 }
 0x201   :  { %502 = shalt.err (!%p499_p1)
}
 0x202   :  { %430 = dma.vmem_to_hbm [thread:$0]  %s425_s27, 2048, %s695_s5, [#allocation4], %s508_s28, %s508_s28, %s509_s29  }
 0x203   :  { %505 = dma.done.wait [#allocation4], 2048  }
 0x204   :  { %506 = vsyncadd [#allocation4], 4294965248 }
 0x205   :  { %434 = vsyncpa [#allocation3], 1 }
 0x206   :  { %435 = vsyncpa [#allocation4], 1 }

</bundles_post_ra>
